<compile_context>
chip_gen: v7x
topology: tpu7x:2x2x1
jax: 0.10.0
libtpu: 0.0.40
codegen_flags: <defaults>
</compile_context>

<pallas_src>
import functools

import numpy as np
import jax
import jax.numpy as jnp
from jax import lax
from jax.experimental import pallas as pl
from jax.experimental.pallas import tpu as pltpu


def _sublane_multiple(dtype) -> int:
    itemsize = jnp.dtype(dtype).itemsize
    return {4: 8, 2: 16, 1: 32}.get(itemsize, 8)


def _round_up(v: int, m: int) -> int:
    return ((v + m - 1) // m) * m


def _pad_kernel(pm_ref, *refs, R, s, top, rows_in, left, right, value,
                use_hi, mask_rows, mask_plane):
    if use_hi:
        lo_ref, hi_ref, o_ref = refs
    else:
        (lo_ref, o_ref), hi_ref = refs, None

    dtype = o_ref.dtype
    fill = jnp.asarray(value, dtype=dtype)

    # Assemble the R rows of input data feeding this output row-tile.
    if use_hi:
        both = jnp.concatenate([lo_ref[...], hi_ref[...]], axis=1)  # (1, 2R, cols_in)
        data = both[:, s:s + R, :]                                  # static shift
    else:
        data = lo_ref[...]

    # Mask rows that fall in the row padding and planes that are pure fill.
    if mask_rows or mask_plane:
        valid = jnp.ones((1, R, 1), dtype=jnp.bool_)
        if mask_rows:
            gor = pl.program_id(1) * R + lax.broadcasted_iota(jnp.int32, (1, R, 1), 1)
            valid = jnp.logical_and(gor >= top, gor < top + rows_in)
        if mask_plane:
            valid = jnp.logical_and(valid, pm_ref[pl.program_id(0)] >= 0)
        data = jnp.where(valid, data, fill)

    # Lane (last-dim) padding: build the full lane-dense output block and store once.
    if left or right:
        parts = []
        if left:
            parts.append(jnp.full((1, R, left), fill, dtype=dtype))
        parts.append(data)
        if right:
            parts.append(jnp.full((1, R, right), fill, dtype=dtype))
        data = jnp.concatenate(parts, axis=-1)

    o_ref[...] = data


def pad_constant(x, padding, value=0.0):
    """Pallas TPU equivalent of F.pad(x, padding, mode='constant', value=value)."""
    padding = tuple(int(p) for p in padding)
    assert len(padding) % 2 == 0, "padding must have an even number of entries"
    k = len(padding) // 2
    nd = x.ndim
    assert k <= nd, "padding covers more dims than the input has"
    # TODO(synk): negative (cropping) padding is not supported by this kernel.
    assert all(p >= 0 for p in padding), "negative padding not supported"

    if all(p == 0 for p in padding):
        return x

    before = [0] * nd
    after = [0] * nd
    for i in range(k):
        d = nd - 1 - i
        before[d] = padding[2 * i]
        after[d] = padding[2 * i + 1]
    out_shape = tuple(x.shape[d] + before[d] + after[d] for d in range(nd))

    cols_in = x.shape[-1]
    left, right = before[-1], after[-1]
    cols_out = cols_in + left + right

    pads_beyond_last = any(before[d] or after[d] for d in range(nd - 1))
    if not pads_beyond_last:
        # Only the lane dim is padded: collapse everything else into rows (bigger tiles).
        rows_in = int(np.prod(x.shape[:-1], dtype=np.int64))
        rows_out = rows_in
        top = bot = 0
        outer_out = 1
        plane_map = np.zeros((1,), dtype=np.int32)
        mask_plane = False
        x3 = x.reshape(1, rows_in, cols_in)
    else:
        rows_in = x.shape[-2]
        top, bot = before[-2], after[-2]
        rows_out = rows_in + top + bot
        lead_out_shape = out_shape[:-2]
        outer_in = int(np.prod(x.shape[:-2], dtype=np.int64))
        outer_out = int(np.prod(lead_out_shape, dtype=np.int64))
        if any(before[d] or after[d] for d in range(nd - 2)):
            coords = np.indices(lead_out_shape).reshape(len(lead_out_shape), -1)
            valid = np.ones(coords.shape[1], dtype=bool)
            in_flat = np.zeros(coords.shape[1], dtype=np.int64)
            for d in range(nd - 2):
                c, b, sz = coords[d], before[d], x.shape[d]
                valid &= (c >= b) & (c < b + sz)
                in_flat = in_flat * sz + np.clip(c - b, 0, sz - 1)
            plane_map = np.where(valid, in_flat, -1).astype(np.int32)
            mask_plane = bool(np.any(~valid))
        else:
            plane_map = np.arange(outer_out, dtype=np.int32)
            mask_plane = False
        x3 = x.reshape(outer_in, rows_in, cols_in)

    dtype = x.dtype
    itemsize = jnp.dtype(dtype).itemsize
    sub = _sublane_multiple(dtype)

    # ~1 MiB output blocks (mem-bound kernel; large DMAs amortize per-step overhead),
    # dtype-aware sublane multiple, capped by the row count.
    target_block_bytes = 1 << 20
    row_bytes = max(cols_out * itemsize, 1)
    R = max(sub, (target_block_bytes // row_bytes) // sub * sub)
    rows_cap = _round_up(rows_out, sub)
    R = min(R, rows_cap)
    # Keep >=2 grid steps when possible so v7x megacore gets both TensorCores busy.
    if outer_out * pl.cdiv(rows_out, R) < 2 and rows_cap > sub:
        R = max(sub, _round_up(rows_cap // 2, sub))

    s = (-top) % R                      # static sublane shift between out/in row tiles
    use_hi = s != 0                     # need a second input row-block only if shifted
    shift_blocks = (top + R - 1) // R   # ceil(top / R)
    nb_in = pl.cdiv(rows_in, R)
    n_row_tiles = pl.cdiv(rows_out, R)
    mask_rows = (top > 0) or (bot > 0)

    def lo_map(o, r, pm):
        plane = jnp.maximum(pm[o], 0)
        b = jnp.clip(r - shift_blocks, 0, nb_in - 1)
        return (plane, b, 0)

    def hi_map(o, r, pm):
        plane = jnp.maximum(pm[o], 0)
        b = jnp.clip(r - shift_blocks + 1, 0, nb_in - 1)
        return (plane, b, 0)

    in_specs = [pl.BlockSpec((1, R, cols_in), lo_map)]
    inputs = [jnp.asarray(plane_map), x3]
    if use_hi:
        in_specs.append(pl.BlockSpec((1, R, cols_in), hi_map))
        inputs.append(x3)
    out_spec = pl.BlockSpec((1, R, cols_out), lambda o, r, pm: (o, r, 0))

    kernel = functools.partial(
        _pad_kernel, R=R, s=s, top=top, rows_in=rows_in, left=left, right=right,
        value=value, use_hi=use_hi, mask_rows=mask_rows, mask_plane=mask_plane)

    n_in_blocks = 2 if use_hi else 1
    footprint = 2 * (R * cols_out + n_in_blocks * R * cols_in) * itemsize
    vmem_limit = int(min(max(4 * footprint, 32 << 20), 64 << 20))

    out3 = pl.pallas_call(
        kernel,
        out_shape=jax.ShapeDtypeStruct((outer_out, rows_out, cols_out), dtype),
        grid_spec=pltpu.PrefetchScalarGridSpec(
            num_scalar_prefetch=1,
            grid=(outer_out, n_row_tiles),
            in_specs=in_specs,
            out_specs=out_spec,
        ),
        compiler_params=pltpu.CompilerParams(
            dimension_semantics=("parallel", "parallel"),
            vmem_limit_bytes=vmem_limit,
        ),
    )(*inputs)

    return out3.reshape(out_shape)


class Pad:
    """Mirror of the PyTorch module: Pad(padding, value).__call__(x) == F.pad(x, padding, value=value)."""

    def __init__(self, padding, value=0.0):
        self.padding = padding
        self.value = value

    def __call__(self, x):
        return pad_constant(x, self.padding, self.value)


def pad_ref(x, padding, value=0.0):
    """Pure-JAX reference mirroring torch.nn.functional.pad (constant mode)."""
    nd = x.ndim
    k = len(padding) // 2
    pw = [(0, 0)] * nd
    for i in range(k):
        d = nd - 1 - i
        pw[d] = (int(padding[2 * i]), int(padding[2 * i + 1]))
    return jnp.pad(x, pw, mode="constant",
                   constant_values=jnp.asarray(value, dtype=x.dtype))


if __name__ == "__main__":
    key = jax.random.PRNGKey(0)

    # Case 1: classic spatial pad on (B, C, H, W) — pads last two dims.
    x1 = jax.random.normal(key, (2, 4, 16, 16), dtype=jnp.float32)
    pad1 = (1, 1, 2, 2)
    out1 = jax.block_until_ready(Pad(pad1, value=0.0)(x1))
    ref1 = pad_ref(x1, pad1, 0.0)
    assert out1.shape == ref1.shape and out1.dtype == x1.dtype
    assert bool(jnp.array_equal(out1, ref1)), "case 1 mismatch"

    # Case 2: last-dim-only pad with a non-zero fill value.
    x2 = jax.random.normal(jax.random.fold_in(key, 1), (2, 8, 32), dtype=jnp.float32)
    pad2 = (3, 1)
    out2 = jax.block_until_ready(Pad(pad2, value=-1.5)(x2))
    assert bool(jnp.array_equal(out2, pad_ref(x2, pad2, -1.5))), "case 2 mismatch"

    # Case 3: causal pad of a leading (frame) dim, as used in imagen-video.
    x3 = jax.random.normal(jax.random.fold_in(key, 2), (2, 4, 6, 8, 8), dtype=jnp.float32)
    pad3 = (0, 0, 0, 0, 2, 0)
    out3 = jax.block_until_ready(Pad(pad3, value=0.0)(x3))
    assert bool(jnp.array_equal(out3, pad_ref(x3, pad3, 0.0))), "case 3 mismatch"

    print("KERNEL_OK")
</pallas_src>

<mosaic_0001>
module attributes {stable_mosaic.version = 11 : i64} {
  func.func @_pad_kernel(%arg0: i32, %arg1: i32, %arg2: memref<8xi32, #tpu.memory_space<smem>>, %arg3: memref<1x24x16xf32, #tpu.memory_space<vmem>>, %arg4: memref<1x24x16xf32, #tpu.memory_space<vmem>>, %arg5: memref<1x24x18xf32, #tpu.memory_space<vmem>>) attributes {dimension_semantics = [#tpu.dimension_semantics<parallel>, #tpu.dimension_semantics<parallel>], iteration_bounds = array<i64: 8, 1>, scalar_prefetch = 1 : i64, scratch_operands = 0 : i64, tpu.core_type = #tpu.core_type<tc>, window_params = [{transform_indices = @transform_0, window_bounds = array<i64: 1, 24, 16>}, {transform_indices = @transform_1, window_bounds = array<i64: 1, 24, 16>}, {transform_indices = @transform_2, window_bounds = array<i64: 1, 24, 18>}]} {
    %c0 = arith.constant 0 : index
    %c0_0 = arith.constant 0 : index
    %c0_1 = arith.constant 0 : index
    %0 = vector.load %arg3[%c0, %c0_0, %c0_1] : memref<1x24x16xf32, #tpu.memory_space<vmem>>, vector<1x24x16xf32>
    %c0_2 = arith.constant 0 : index
    %c0_3 = arith.constant 0 : index
    %c0_4 = arith.constant 0 : index
    %1 = vector.load %arg4[%c0_2, %c0_3, %c0_4] : memref<1x24x16xf32, #tpu.memory_space<vmem>>, vector<1x24x16xf32>
    %2 = tpu.concatenate %0, %1 in 1 : vector<1x24x16xf32>, vector<1x24x16xf32> -> vector<1x48x16xf32>
    %3 = vector.extract_strided_slice %2 {offsets = [0, 22, 0], sizes = [1, 24, 16], strides = [1, 1, 1]} : vector<1x48x16xf32> to vector<1x24x16xf32>
    %c24_i32 = arith.constant 24 : i32
    %4 = arith.muli %arg1, %c24_i32 : i32
    %5 = tpu.iota {dimensions = array<i32: 1>} : vector<1x24x1xi32>
    %6 = vector.broadcast %4 : i32 to vector<1x24x1xi32>
    %7 = arith.addi %6, %5 : vector<1x24x1xi32>
    %c2_i32 = arith.constant 2 : i32
    %8 = vector.broadcast %c2_i32 : i32 to vector<1x24x1xi32>
    %9 = arith.cmpi sge, %7, %8 : vector<1x24x1xi32>
    %c18_i32 = arith.constant 18 : i32
    %10 = vector.broadcast %c18_i32 : i32 to vector<1x24x1xi32>
    %11 = arith.cmpi slt, %7, %10 : vector<1x24x1xi32>
    %12 = arith.andi %9, %11 : vector<1x24x1xi1>
    %cst = arith.constant 0.000000e+00 : f32
    %13 = vector.shape_cast %12 : vector<1x24x1xi1> to vector<1x24x1xi1>
    %14 = vector.broadcast %13 : vector<1x24x1xi1> to vector<1x24x16xi1>
    %15 = vector.broadcast %cst : f32 to vector<1x24x16xf32>
    %16 = arith.select %14, %3, %15 : vector<1x24x16xi1>, vector<1x24x16xf32>
    %cst_5 = arith.constant 0.000000e+00 : f32
    %17 = vector.broadcast %cst_5 : f32 to vector<1x24x1xf32>
    %cst_6 = arith.constant 0.000000e+00 : f32
    %18 = vector.broadcast %cst_6 : f32 to vector<1x24x1xf32>
    %19 = tpu.concatenate %17, %16, %18 in 2 : vector<1x24x1xf32>, vector<1x24x16xf32>, vector<1x24x1xf32> -> vector<1x24x18xf32>
    %c0_7 = arith.constant 0 : index
    %c0_8 = arith.constant 0 : index
    %c0_9 = arith.constant 0 : index
    %20 = vector.load %arg5[%c0_7, %c0_8, %c0_9] : memref<1x24x18xf32, #tpu.memory_space<vmem>>, vector<1x24x18xf32>
    tpu.vector_store %arg5[%c0_7, %c0_8, %c0_9], %19 {strides = array<i32>} : memref<1x24x18xf32, #tpu.memory_space<vmem>>, vector<1x24x18xf32>,
    return
  }
  func.func @transform_0(%arg0: i32, %arg1: i32, %arg2: memref<8xi32, #tpu.memory_space<smem>>) -> (i32, i32, i32) {
    %0 = arith.index_cast %arg0 : i32 to index
    %1 = memref.load %arg2[%0] : memref<8xi32, #tpu.memory_space<smem>>
    %c0_i32 = arith.constant 0 : i32
    %2 = arith.maxsi %1, %c0_i32 : i32
    %c1_i32 = arith.constant 1 : i32
    %3 = arith.subi %arg1, %c1_i32 : i32
    %c0_i32_0 = arith.constant 0 : i32
    %c0_i32_1 = arith.constant 0 : i32
    %4 = arith.maxsi %c0_i32_0, %3 : i32
    %5 = arith.minsi %c0_i32_1, %4 : i32
    %c0_i32_2 = arith.constant 0 : i32
    %c0_i32_3 = arith.constant 0 : i32
    return %2, %5, %c0_i32_2 : i32, i32, i32
  }
  func.func @transform_1(%arg0: i32, %arg1: i32, %arg2: memref<8xi32, #tpu.memory_space<smem>>) -> (i32, i32, i32) {
    %0 = arith.index_cast %arg0 : i32 to index
    %1 = memref.load %arg2[%0] : memref<8xi32, #tpu.memory_space<smem>>
    %c0_i32 = arith.constant 0 : i32
    %2 = arith.maxsi %1, %c0_i32 : i32
    %c1_i32 = arith.constant 1 : i32
    %3 = arith.subi %arg1, %c1_i32 : i32
    %c1_i32_0 = arith.constant 1 : i32
    %4 = arith.addi %3, %c1_i32_0 : i32
    %c0_i32_1 = arith.constant 0 : i32
    %c0_i32_2 = arith.constant 0 : i32
    %5 = arith.maxsi %c0_i32_1, %4 : i32
    %6 = arith.minsi %c0_i32_2, %5 : i32
    %c0_i32_3 = arith.constant 0 : i32
    %c0_i32_4 = arith.constant 0 : i32
    return %2, %6, %c0_i32_3 : i32, i32, i32
  }
  func.func @transform_2(%arg0: i32, %arg1: i32, %arg2: memref<8xi32, #tpu.memory_space<smem>>) -> (i32, i32, i32) {
    %c0_i32 = arith.constant 0 : i32
    %c0_i32_0 = arith.constant 0 : i32
    return %arg0, %arg1, %c0_i32 : i32, i32, i32
  }
}

</mosaic_0001>

<bundles_post_ra>
// kernel: tpu_custom_call.1
= control target key start
LH: loop header
LB: loop body
LE: loop exit
PB: predicated region body
PF: predicated region fallthrough
CT: control target
= control target key end

     0   :  { %s975_s0 = inlined_call_operand.hbm [shape: s32[8], index: 0, kind: input, shape index: {}]   ;;  %s976_s1 = inlined_call_operand.hbm [shape: f32[8,16,16], index: 1, kind: input, shape index: {}]   ;;  %s977_s2 = inlined_call_operand.hbm [shape: f32[8,16,16], index: 2, kind: input, shape index: {}]   ;;  %s978_s3 = inlined_call_operand.vmem [shape: f32[8,20,18], index: 3, kind: output, shape index: {}]  }
   0x1   :  { %s604_s14 = scalar_lea.hbm %s975_s0, 16 }
   0x2   :  { %p605_p0 = scmp.ne.s32.totalorder %s975_s0, %s604_s14  ;;  %p608_p1 = scmp.lt.u32.totalorder %s604_s14, %s975_s0 }
   0x4   :  { %p610_p2 = pnand %p608_p1, %p605_p0 }
   0x6   :  { %613 = shalt.err (!%p610_p2)  }
   0x7   :  { %s744_s19 = smov [#allocation3]  }
   0x8   :  { %9 = dma.hbm_to_smem %s975_s0, 16, %s744_s19, [#allocation2] }
   0x9   :  { %698 = dma.done.wait [#allocation2], 16 }
   0xa   :  { %699 = vsyncadd [#allocation2], 4294967280 }
   0xb   :  { %11 = sfence }
   0xc   :  { %12 = vsyncpa [#allocation5], 0 }
   0xd   :  { %14 = vsyncpa [#allocation5 + $0x1], 0 }
   0xe   :  { %15 = vsyncpa [#allocation7], 0 }
   0xf   :  { %17 = vsyncpa [#allocation7 + $0x1], 0  ;;  %s784_s22 = smov 0   ;;  %s786_s23 = smov 0  }
  0x10   :  { %s788_s24 = smov 0   ;;  %s790_s25 = smov 0  }
  0x11   :  { %s792_s26 = smov 0   ;;  %s794_s27 = smov 0  }
  0x12   :  { %s796_s0 = smov 0   ;;  %s798_s28 = smov 0  }
  0x13   :  { %s800_s29 = smov 0  }
  0x14 LB: > { %s35_s30 = sadd.s32 1, %s738_s28  ;;  %s39_s4 = sld [smem:[#allocation3 + %s738_s28]]  ;;  %s742_s29 = sphi %s800_s29, %s23_s29   ;;  %s738_s28 = sphi %s798_s28, %s993_s28   ;;  %s734_s0 = sphi %s796_s0, %s992_s0   ;;  %s730_s27 = sphi %s794_s27, %s991_s27   ;;  %s726_s26 = sphi %s792_s26, %s990_s26   ;;  %s722_s25 = sphi %s790_s25, %s989_s25   ;;  %s718_s24 = sphi %s788_s24, %s988_s24   ;;  %s714_s23 = sphi %s786_s23, %s987_s23   ;;  %s710_s22 = sphi %s784_s22, %s986_s22  }
  0x15   : > { %p37_p3 = scmp.ge.s32.totalorder %s35_s30, 8  ;;  %s505_s5 = sadd.s32 4294967295, %s742_s29  }
  0x16   : > { %p67_p4 = scmp.ne.s32.totalorder %s730_s27, %s726_s26  ;;  %p68_p5 = scmp.eq.s32.totalorder %s742_s29, 0 }
  0x17   : > { %s995_s30 = smov (%p37_p3, %s35_s30), 0  ;;  %p73_p6 = scmp.ne.s32.totalorder %s726_s26, %s722_s25 }
  0x18   : > { %s47_s6 = sld [smem:[#allocation3 + %s995_s30]]  ;;  %p837_p7 = scmp.eq.s32.totalorder %s505_s5, 0 }
  0x19   : > { %p843_p8 = por %p68_p5, %p67_p4  ;;  %s83_s9 = sld [smem:[#allocation3 + %s738_s28]] }
  0x1a   : > { %p40_p9 = scmp.gt.s32.totalorder %s39_s4, 0  ;;  %p850_p10 = por %p837_p7, %p73_p6 }
  0x1b   : > { %s90_s11 = sld [smem:[#allocation3 + %s995_s30]]  ;;  %s60_s12 = sadd.s32 1, %s730_s27 }
  0x1c   : > { %s997_s4 = smov (!%p40_p9, %s39_s4), 0  ;;  %p109_p11 = scmp.ne.s32.totalorder %s718_s24, %s714_s23 }
  0x1d   : > { %p115_p13 = scmp.ne.s32.totalorder %s714_s23, %s710_s22  ;;  %s102_s18 = sadd.s32 1, %s718_s24 }
  0x1e   : > { %p48_p12 = scmp.gt.s32.totalorder %s47_s6, 0  ;;  %p862_p1 = por %p109_p11, %p68_p5 }
  0x1f   : > { %p84_p0 = scmp.gt.s32.totalorder %s83_s9, 0  ;;  %p868_p4 = por %p115_p13, %p837_p7 }
  0x20   : > { %s999_s6 = smov (!%p48_p12, %s47_s6), 0  ;;  %p508_p5 = scmp.ge.s32.totalorder %s742_s29, 8 }
  0x21   : > { %s1001_s9 = smov (!%p84_p0, %s83_s9), 0  ;;  %s55_s14 = ssub.s32 %s997_s4, %s999_s6 }
  0x22   : > { %p91_p2 = scmp.gt.s32.totalorder %s90_s11, 0  ;;  %p58_p3 = scmp.eq.s32.totalorder %s55_s14, 0 }
  0x23   : > { %s984_s15 = scalar_select %p868_p4, 1, 0 }
  0x24   : > { %s1003_s11 = smov (!%p91_p2, %s90_s11), 0  ;;  %163 = sbr.rel (%p508_p5) target bundleno = 111 (0x6f), region = 16 }
  0x25   : > { %s873_s16 = scalar_select %p58_p3, %s730_s27, %s60_s12  }
  0x26   : > { %s97_s17 = ssub.s32 %s1001_s9, %s1003_s11 }
  0x27   : > { %p100_p6 = scmp.eq.s32.totalorder %s97_s17, 0 }
  0x29   : > { %s877_s19 = scalar_select %p100_p6, %s718_s24, %s102_s18  }
  0x2b   : > { %166 = sbr.rel (!%p843_p8) target bundleno = 77 (0x4d), region = 20  ;;  %s167_s20 = sand.u32 (%p843_p8), 1, %s730_s27  }
  0x2c   : > { %s172_s21 = sld [smem:[#allocation3 + %s738_s28]] (%p843_p8)  ;;  %s519_s22 = smul.u32 (%p843_p8), 24, %s167_s20 }
  0x2d   : > { %s884_s25 = scalar_lea.sflag (%p843_p8), [#allocation5], %s167_s20 }
  0x2e   : > { %s171_s4 = scalar_lea.vmem (%p843_p8), [#allocation4], %s519_s22 }
  0x32   : > { %p173_p7 = scmp.gt.s32.totalorder %s172_s21, 0 }
  0x34   : > { %s1005_s21 = smov (!%p173_p7, %s172_s21), 0 }
  0x35   : > { %185 = vsyncadd %s884_s25, 128  ;;  %s517_s5 = sshll.u32 %s1005_s21, 8  ;;  %s192_s6 = sshll.u32 %s171_s4, 4  ;;  %s193_s6 = int_to_ptr.vmem [resolvable:$true] %s192_s6 }
  0x36   : > { %s890_s11 = scalar_lea.hbm %s976_s1, %s517_s5  ;;  %s616_s17 = scalar_lea.hbm %s976_s1, 2048 }
  0x37   : > { %s614_s8 = scalar_lea.hbm %s890_s11, 256  ;;  %p617_p9 = scmp.lt.u32.totalorder %s890_s11, %s976_s1 }
  0x38   : > { %p615_p8 = scmp.ne.s32.totalorder %s890_s11, %s614_s8  ;;  %p618_p11 = scmp.lt.u32.totalorder %s616_s17, %s614_s8 }
  0x39   : > { %p620_p13 = scmp.lt.u32.totalorder %s614_s8, %s890_s11 }
  0x3a   : > { %p619_p12 = por %p618_p11, %p617_p9 }
  0x3c   : > { %p621_p0 = por %p620_p13, %p619_p12 }
  0x3e   : > { %p622_p2 = pnand %p621_p0, %p615_p8 }
  0x40   : > { %625 = shalt.err (!%p622_p2)
}
  0x41   : > { %s626_s21 = scalar_lea.vmem %s193_s6, 256  ;;  %s745_s22 = smov [#allocation4]  }
  0x42   : > { %p627_p3 = scmp.ne.s32.totalorder %s193_s6, %s626_s21  ;;  %s628_s4 = sshll.u32 %s745_s22, 4  ;;  %s629_s4 = int_to_ptr.vmem [resolvable:$false] %s628_s4 }
  0x43   : > { %s630_s5 = scalar_lea.vmem %s629_s4, 768  ;;  %p631_p6 = scmp.lt.s32.totalorder %s193_s6, %s629_s4 }
  0x44   : > { %p632_p5 = scmp.lt.s32.totalorder %s630_s5, %s626_s21 }
  0x46   : > { %p633_p7 = por %p632_p5, %p631_p6 }
  0x48   : > { %p634_p4 = pnand %p633_p7, %p627_p3 }
  0x4a   : > { %637 = shalt.err (!%p634_p4)
}
  0x4b   : > { %s746_s7 = smov 128   ;;  %s747_s9 = smov 8  }
  0x4c   : > { %198 = dma.hbm_to_vmem [thread:$0]  %s890_s11, 256, %s193_s6, %s884_s25, %s746_s7, %s746_s7, %s747_s9  }
  0x4d PF: > { %201 = sbr.rel (!%p862_p1) target bundleno = 111 (0x6f), region = 24  ;;  %s202_s8 = sand.u32 (%p862_p1), 1, %s718_s24  }
  0x4e   : > { %s207_s12 = sld [smem:[#allocation3 + %s738_s28]] (%p862_p1)  ;;  %s520_s14 = smul.u32 (%p862_p1), 24, %s202_s8 }
  0x4f   : > { %s908_s17 = scalar_lea.sflag (%p862_p1), [#allocation7], %s202_s8 }
  0x50   : > { %s206_s18 = scalar_lea.vmem (%p862_p1), [#allocation6], %s520_s14 }
  0x54   : > { %p208_p8 = scmp.gt.s32.totalorder %s207_s12, 0 }
  0x56   : > { %s1007_s12 = smov (!%p208_p8, %s207_s12), 0 }
  0x57   : > { %219 = vsyncadd %s908_s17, 128  ;;  %s518_s20 = sshll.u32 %s1007_s12, 8  ;;  %s226_s21 = sshll.u32 %s206_s18, 4  ;;  %s227_s21 = int_to_ptr.vmem [resolvable:$true] %s226_s21 }
  0x58   : > { %s914_s6 = scalar_lea.hbm %s977_s2, %s518_s20  ;;  %s640_s5 = scalar_lea.hbm %s977_s2, 2048 }
  0x59   : > { %s638_s13 = scalar_lea.hbm %s914_s6, 256  ;;  %p641_p4 = scmp.lt.u32.totalorder %s914_s6, %s977_s2 }
  0x5a   : > { %p639_p1 = scmp.ne.s32.totalorder %s914_s6, %s638_s13  ;;  %p642_p9 = scmp.lt.u32.totalorder %s640_s5, %s638_s13 }
  0x5b   : > { %p644_p12 = scmp.lt.u32.totalorder %s638_s13, %s914_s6 }
  0x5c   : > { %p643_p11 = por %p642_p9, %p641_p4 }
  0x5e   : > { %p645_p13 = por %p644_p12, %p643_p11 }
  0x60   : > { %p646_p0 = pnand %p645_p13, %p639_p1 }
  0x62   : > { %649 = shalt.err (!%p646_p0)
}
  0x63   : > { %s650_s8 = scalar_lea.vmem %s227_s21, 256  ;;  %s748_s12 = smov [#allocation6]  }
  0x64   : > { %p651_p2 = scmp.ne.s32.totalorder %s227_s21, %s650_s8  ;;  %s652_s14 = sshll.u32 %s748_s12, 4  ;;  %s653_s14 = int_to_ptr.vmem [resolvable:$false] %s652_s14 }
  0x65   : > { %s654_s18 = scalar_lea.vmem %s653_s14, 768  ;;  %p655_p3 = scmp.lt.s32.totalorder %s227_s21, %s653_s14 }
  0x66   : > { %p656_p6 = scmp.lt.s32.totalorder %s654_s18, %s650_s8 }
  0x68   : > { %p657_p5 = por %p656_p6, %p655_p3 }
  0x6a   : > { %p658_p7 = pnand %p657_p5, %p651_p2 }
  0x6c   : > { %661 = shalt.err (!%p658_p7)
}
  0x6d   : > { %s749_s20 = smov 128   ;;  %s750_s22 = smov 8  }
  0x6e   : > { %232 = dma.hbm_to_vmem [thread:$0]  %s914_s6, 256, %s227_s21, %s908_s17, %s749_s20, %s749_s20, %s750_s22  }
  0x6f PF: > { %p513_p8 = scmp.ge.s32.totalorder %s742_s29, 1  ;;  %p234_p1 = scmp.lt.s32.totalorder %s742_s29, 9 }
  0x71   : > { %p235_p4 = pnand %p513_p8, %p234_p1 }
  0x72   : > { %s240_s25 = sand.u32 (!%p235_p4), 1, %s726_s26  }
  0x73   : > { %238 = sbr.rel (%p235_p4) target bundleno = 256 (0x100), region = 28  ;;  %s241_s11 = scalar_lea.sflag (!%p235_p4), [#allocation5], %s240_s25 }
  0x74   : > { %s521_s13 = smul.u32 (!%p235_p4), 24, %s240_s25 }
  0x76   : > { %s244_s4 = scalar_lea.vmem (!%p235_p4), [#allocation4], %s521_s13 }
  0x7a   : > { %701 = dma.done.wait (%p850_p10), %s241_s11, 384  }
  0x7b   : > { %703 = vsyncadd (%p850_p10), %s241_s11, 4294966912  ;;  %s249_s17 = sand.u32 1, %s714_s23   ;;  %p985_p9 = scmp.ne.s32.totalorder %s984_s15, 0 }
  0x7c   : > { %s522_s21 = smul.u32 24, %s249_s17  ;;  %s250_s6 = scalar_lea.sflag [#allocation7], %s249_s17 }
  0x7e   : > { %s253_s5 = scalar_lea.vmem [#allocation6], %s522_s21 }
  0x7f   : > { %705 = dma.done.wait (%p985_p9), %s250_s6, 384  }
  0x80   : > { %707 = vsyncadd (%p985_p9), %s250_s6, 4294966912  ;;  %v319_v0 = vlaneseq  ;;  %v314_v3 = vld [vmem:[%s244_s4 + $0x10] sm:$0xff]  ;;  %vm346_vm0 = vcmask 1041408   ;;  %v316_v5 = vld [vmem:[%s253_s5 + $0x8] sm:$0xff]  ;;  %s751_s10 = smov 1   ;;  %p305_p10 = scmp.lt.s32.totalorder %s734_s0, 7 }
  0x81   : > { %v315_v4 = vld [vmem:[%s253_s5] sm:$0xff]  ;;  %v347_v6 = vrot.slane %v314_v3, 6  ;;  %v317_v8 = vld [vmem:[%s253_s5 + $0x10] sm:$0xff]  ;;  %v350_v9 = vrot.slane %v316_v5, 6  ;;  %vm372_vm3 = vcmask 7168   ;;  %vm376_vm4 = vcmask 138240  }
  0x82   : > { %v320_v1 = vshrl.u32 %v319_v0, 7  ;;  %v348_v7 = vrot.slane %v315_v4, 6  ;;  %v352_v10 = vrot.slane %v317_v8, 6  ;;  %s1009_s0 = smov (!%p305_p10, %s734_s0), 7  ;;  %vm380_vm5 = vcmask 146432  }
  0x83   : > { %s523_s15 = smul.u32 24, %s1009_s0 }
  0x84   : > { %v322_v2 = vadd.s32 16, %v320_v1  ;;  %vm327_vm1 = vcmp.ge.s32.totalorder %v320_v1, 2  ;;  %v349_v11 = vsel %vm346_vm0, %v347_v6, %v348_v7  ;;  %v353_v13 = vsel %vm346_vm0, %v350_v9, %v352_v10 }
  0x85   : > { %v357_v12 = vsel %vm327_vm1, %v349_v11, 0.0  ;;  %v351_v15 = vsel %vm346_vm0, %v348_v7, %v350_v9  ;;  %s312_s8 = scalar_lea.vmem %s978_s3, %s523_s15 }
  0x86   : > { %vm332_vm2 = vcmp.lt.s32.totalorder %v322_v2, 18  ;;  %363 = vrot.lane.b32.xlu0 %v357_v12, %s751_s10 }
  0x87   : > { %v359_v14 = vsel %vm332_vm2, %v353_v13, 0.0 }
  0x88   : > { %367 = vrot.lane.b32.xlu1 %v359_v14, %s751_s10 }
  0x8a   : > { %365 = vrot.lane.b32.xlu0 %v351_v15, %s751_s10 }
  0xf8   : > { %v364_v16 = vpop.permute.xlu0 %363 }
  0xf9   : > { %v373_v17 = vsel %vm372_vm3, 0.0, %v364_v16 }
  0xfa   : > { %v368_v18 = vpop.permute.xlu1 %367  ;;  %v377_v19 = vsel %vm376_vm4, %v373_v17, 0.0 }
  0xfb   : > { %v375_v20 = vsel %vm372_vm3, 0.0, %v368_v18  ;;  %381 = vst.msk [vmem:[%s312_s8] sm:$0xff] %vm380_vm5, %v377_v19 }
  0xfc   : > { %v379_v21 = vsel %vm376_vm4, %v375_v20, 0.0  ;;  %v366_v22 = vpop.permute.xlu0 %365 }
  0xfd   : > { %383 = vst.msk [vmem:[%s312_s8 + $0x10] sm:$0xff] %vm380_vm5, %v379_v21  ;;  %v374_v23 = vsel %vm372_vm3, 0.0, %v366_v22 }
  0xfe   : > { %v378_v24 = vsel %vm376_vm4, %v374_v23, 0.0 }
  0xff   : > { %382 = vst.msk [vmem:[%s312_s8 + $0x8] sm:$0xff] %vm380_vm5, %v378_v24 }
 0x100 PF: > { %s23_s29 = sadd.s32 1, %s742_s29   ;;  %s986_s22 = smov %s714_s23 }
 0x101   : > { %p20_p11 = scmp.ge.s32.totalorder %s23_s29, 10   ;;  %s987_s23 = smov %s718_s24 }
 0x102   : > { %s988_s24 = smov %s877_s19  ;;  %s989_s25 = smov %s726_s26 }
 0x103   : > { %s990_s26 = smov %s730_s27  ;;  %s991_s27 = smov %s873_s16 }
 0x104   : > { %s992_s0 = smov %s738_s28  ;;  %s993_s28 = smov %s995_s30 }
 0x105   :  { %22 = sbr.rel (!%p20_p11) target bundleno = 20 (0x14), region = 81 }
 0x10c   :  { %414 = vsyncpa [#allocation5], 1 }
 0x10d   :  { %416 = vsyncpa [#allocation5 + $0x1], 1 }
 0x10e   :  { %417 = vsyncpa [#allocation7], 1 }
 0x10f   :  { %419 = vsyncpa [#allocation7 + $0x1], 1 }

</bundles_post_ra>
